<compile_context>
chip_gen: v5e
topology: v5e:2x2
jax: 0.10.0
libtpu: 0.0.40
codegen_flags: <defaults>
</compile_context>

<pallas_src>
import math

import jax
import jax.numpy as jnp
from jax.experimental import pallas as pl
from jax.experimental.pallas import tpu as pltpu


LANE = 128  # TPU lane width; feature dims are padded to multiples of this.


def _round_up(x, m):
    return ((x + m - 1) // m) * m


def _make_mlp_kernel(num_layers):
    """Build a fused MLP kernel for a fixed (static) number of layers."""

    def kernel(x_ref, *refs):
        # refs = [w0, b0, w1, b1, ..., w_{L-1}, b_{L-1}, out_ref]
        w_refs = refs[0:2 * num_layers:2]
        b_refs = refs[1:2 * num_layers:2]
        out_ref = refs[2 * num_layers]

        h = x_ref[...].astype(jnp.float32)              # (block_rows, d_in)
        for i in range(num_layers):                     # static Python loop
            # bf16 MXU operands, f32 accumulation.
            acc = jnp.dot(h.astype(jnp.bfloat16), w_refs[i][...],
                          preferred_element_type=jnp.float32)
            acc = acc + b_refs[i][...]                  # f32 bias add (VPU)
            h = jnp.maximum(acc, 0.0) if i < num_layers - 1 else acc
        out_ref[...] = h.astype(out_ref.dtype)

    return kernel


def prepare_params(weights, biases, *, weight_dtype=jnp.bfloat16):
    """One-time host-side parameter prep.

    weights[i]: (fan_in, fan_out) pre-transposed, f32.  biases[i]: (fan_out,) or (1, fan_out).
    Returns lane-dense padded bf16 weights, f32 biases, and the true output dim.
    Input feature dim is left unpadded (x is streamed as-is, no extra HBM copy).
    """
    num_layers = len(weights)
    assert len(biases) == num_layers
    d_out = weights[-1].shape[1]

    padded_w, padded_b = [], []
    prev_pad = weights[0].shape[0]                      # input dim: unpadded
    for w, b in zip(weights, biases):
        fan_in, fan_out = w.shape
        fan_out_pad = _round_up(fan_out, LANE)
        wp = jnp.zeros((prev_pad, fan_out_pad), weight_dtype)
        wp = wp.at[:fan_in, :fan_out].set(w.astype(weight_dtype))
        bp = jnp.zeros((1, fan_out_pad), jnp.float32)
        bp = bp.at[:, :fan_out].set(jnp.asarray(b, jnp.float32).reshape(1, -1))
        padded_w.append(wp)
        padded_b.append(bp)
        prev_pad = fan_out_pad
    return padded_w, padded_b, d_out


def _pick_block_rows(n, target):
    """Largest row tile <= target that divides n (pad-free); fallback requests padding."""
    if n <= target:
        return n, False
    for br in (512, 448, 384, 320, 256, 192, 128, 64, 32, 16, 8):
        if br <= target and n % br == 0:
            return br, False
    return min(target, 256), True                       # rare ragged fallback


def mlp_forward(x, padded_w, padded_b, d_out, *, target_block_rows=512):
    """x: (..., input_dim). padded_w/padded_b from prepare_params."""
    num_layers = len(padded_w)
    lead_shape = x.shape[:-1]
    d_in = x.shape[-1]
    d_out_pad = padded_w[-1].shape[1]
    assert padded_w[0].shape[0] == d_in

    x2 = x.reshape(-1, d_in)                            # free reshape, no transpose
    n = x2.shape[0]

    block_rows, need_pad = _pick_block_rows(n, target_block_rows)
    if need_pad:
        n_pad = pl.cdiv(n, block_rows) * block_rows
        x2 = jnp.pad(x2, ((0, n_pad - n), (0, 0)))      # fallback only (ragged rows)
    else:
        n_pad = n

    kernel = _make_mlp_kernel(num_layers)

    in_specs = [pl.BlockSpec((block_rows, d_in), lambda i: (i, 0))]
    flat_params = []
    for w, b in zip(padded_w, padded_b):
        in_specs.append(pl.BlockSpec(w.shape, lambda i: (0, 0)))   # full weight resident
        in_specs.append(pl.BlockSpec(b.shape, lambda i: (0, 0)))   # full bias resident
        flat_params.extend([w, b])

    # Advisory cost estimate for XLA scheduling around the custom call.
    flops = sum(2 * n_pad * w.shape[0] * w.shape[1] for w in padded_w)
    bytes_accessed = int(
        x2.size * x2.dtype.itemsize
        + sum(w.size * w.dtype.itemsize for w in padded_w)
        + sum(b.size * b.dtype.itemsize for b in padded_b)
        + n_pad * d_out_pad * jnp.dtype(x.dtype).itemsize
    )
    cost = pl.CostEstimate(flops=int(flops), transcendentals=0,
                           bytes_accessed=bytes_accessed)

    out = pl.pallas_call(
        kernel,
        out_shape=jax.ShapeDtypeStruct((n_pad, d_out_pad), x.dtype),
        grid=(n_pad // block_rows,),
        in_specs=in_specs,
        out_specs=pl.BlockSpec((block_rows, d_out_pad), lambda i: (i, 0)),
        compiler_params=pltpu.CompilerParams(dimension_semantics=("parallel",)),
        cost_estimate=cost,
    )(x2, *flat_params)

    return out[:n, :d_out].reshape(*lead_shape, d_out)


def init_params(key, input_dim, hidden_dim, output_dim, num_layers):
    """Mimic nn.Linear default init; weights stored PRE-TRANSPOSED as (fan_in, fan_out), f32."""
    dims = [input_dim] + [hidden_dim] * (num_layers - 1) + [output_dim]
    weights, biases = [], []
    for i in range(num_layers):
        key, kw, kb = jax.random.split(key, 3)
        fan_in, fan_out = dims[i], dims[i + 1]
        bound = 1.0 / math.sqrt(fan_in)
        w = jax.random.uniform(kw, (fan_in, fan_out), jnp.float32, -bound, bound)
        b = jax.random.uniform(kb, (1, fan_out), jnp.float32, -bound, bound)
        weights.append(w)
        biases.append(b)
    return weights, biases


def reference(x, weights, biases):
    """Pure-JAX f32 reference matching the PyTorch MLP forward."""
    h = x
    n = len(weights)
    for i, (w, b) in enumerate(zip(weights, biases)):
        h = h @ w + b[0]
        if i < n - 1:
            h = jax.nn.relu(h)
    return h


if __name__ == "__main__":
    key = jax.random.PRNGKey(0)
    k_p, k_x = jax.random.split(key)

    B, Q = 2, 8                                   # batch, queries (seq)
    INPUT_DIM, HIDDEN_DIM, OUTPUT_DIM, NUM_LAYERS = 32, 64, 32, 3

    weights, biases = init_params(k_p, INPUT_DIM, HIDDEN_DIM, OUTPUT_DIM, NUM_LAYERS)
    padded_w, padded_b, d_out = prepare_params(weights, biases)   # one-time prep
    x = jax.random.normal(k_x, (B, Q, INPUT_DIM), jnp.float32)

    out = mlp_forward(x, padded_w, padded_b, d_out)               # grid=(1,), 16-row block
    out = jax.block_until_ready(out)

    ref = reference(x, weights, biases)
    assert out.shape == (B, Q, OUTPUT_DIM)
    # Tolerance loosened vs the all-f32 reference because MXU operands are bf16
    # (f32 accumulation); ~1e-2 relative expected over 3 chained bf16 matmuls.
    assert jnp.allclose(out, ref, atol=3e-2, rtol=3e-2), "mismatch vs reference"
    assert not bool(jnp.any(jnp.isnan(out))), "NaNs in output"
    print("KERNEL_OK")
</pallas_src>

<mosaic_0001>
module attributes {stable_mosaic.version = 11 : i64} {
  func.func @kernel(%arg0: i32, %arg1: memref<16x32xf32, #tpu.memory_space<vmem>>, %arg2: memref<32x128xbf16, #tpu.memory_space<vmem>>, %arg3: memref<1x128xf32, #tpu.memory_space<vmem>>, %arg4: memref<128x128xbf16, #tpu.memory_space<vmem>>, %arg5: memref<1x128xf32, #tpu.memory_space<vmem>>, %arg6: memref<128x128xbf16, #tpu.memory_space<vmem>>, %arg7: memref<1x128xf32, #tpu.memory_space<vmem>>, %arg8: memref<16x128xf32, #tpu.memory_space<vmem>>) attributes {dimension_semantics = [#tpu.dimension_semantics<parallel>], iteration_bounds = array<i64: 1>, scalar_prefetch = 0 : i64, scratch_operands = 0 : i64, tpu.core_type = #tpu.core_type<tc>, window_params = [{transform_indices = @transform_0, window_bounds = array<i64: 16, 32>}, {pipeline_mode = #tpu.pipeline_mode<synchronous>, transform_indices = @transform_1, window_bounds = array<i64: 32, 128>}, {pipeline_mode = #tpu.pipeline_mode<synchronous>, transform_indices = @transform_2, window_bounds = array<i64: 1, 128>}, {pipeline_mode = #tpu.pipeline_mode<synchronous>, transform_indices = @transform_3, window_bounds = array<i64: 128, 128>}, {pipeline_mode = #tpu.pipeline_mode<synchronous>, transform_indices = @transform_4, window_bounds = array<i64: 1, 128>}, {pipeline_mode = #tpu.pipeline_mode<synchronous>, transform_indices = @transform_5, window_bounds = array<i64: 128, 128>}, {pipeline_mode = #tpu.pipeline_mode<synchronous>, transform_indices = @transform_6, window_bounds = array<i64: 1, 128>}, {transform_indices = @transform_7, window_bounds = array<i64: 16, 128>}]} {
    %c0 = arith.constant 0 : index
    %c0_0 = arith.constant 0 : index
    %0 = vector.load %arg1[%c0, %c0_0] : memref<16x32xf32, #tpu.memory_space<vmem>>, vector<16x32xf32>
    %1 = arith.truncf %0 : vector<16x32xf32> to vector<16x32xbf16>
    %c0_1 = arith.constant 0 : index
    %c0_2 = arith.constant 0 : index
    %2 = vector.load %arg2[%c0_1, %c0_2] : memref<32x128xbf16, #tpu.memory_space<vmem>>, vector<32x128xbf16>
    %cst = arith.constant dense<0.000000e+00> : vector<16x128xf32>
    %3 = tpu.matmul %1, %2, %cst {dimension_numbers = #tpu.dot_dimension_numbers<[1], [0], [0], [1], [0, 0, 1, 1], [], []>} : vector<16x32xbf16>, vector<32x128xbf16>, vector<16x128xf32> -> vector<16x128xf32>
    %c0_3 = arith.constant 0 : index
    %c0_4 = arith.constant 0 : index
    %4 = vector.load %arg3[%c0_3, %c0_4] : memref<1x128xf32, #tpu.memory_space<vmem>>, vector<1x128xf32>
    %5 = vector.broadcast %4 : vector<1x128xf32> to vector<16x128xf32>
    %6 = arith.addf %3, %5 : vector<16x128xf32>
    %cst_5 = arith.constant 0.000000e+00 : f32
    %7 = vector.broadcast %cst_5 : f32 to vector<16x128xf32>
    %8 = arith.maximumf %6, %7 : vector<16x128xf32>
    %9 = arith.truncf %8 : vector<16x128xf32> to vector<16x128xbf16>
    %c0_6 = arith.constant 0 : index
    %c0_7 = arith.constant 0 : index
    %10 = vector.load %arg4[%c0_6, %c0_7] : memref<128x128xbf16, #tpu.memory_space<vmem>>, vector<128x128xbf16>
    %cst_8 = arith.constant dense<0.000000e+00> : vector<16x128xf32>
    %11 = tpu.matmul %9, %10, %cst_8 {dimension_numbers = #tpu.dot_dimension_numbers<[1], [0], [0], [1], [0, 0, 1, 1], [], []>} : vector<16x128xbf16>, vector<128x128xbf16>, vector<16x128xf32> -> vector<16x128xf32>
    %c0_9 = arith.constant 0 : index
    %c0_10 = arith.constant 0 : index
    %12 = vector.load %arg5[%c0_9, %c0_10] : memref<1x128xf32, #tpu.memory_space<vmem>>, vector<1x128xf32>
    %13 = vector.broadcast %12 : vector<1x128xf32> to vector<16x128xf32>
    %14 = arith.addf %11, %13 : vector<16x128xf32>
    %cst_11 = arith.constant 0.000000e+00 : f32
    %15 = vector.broadcast %cst_11 : f32 to vector<16x128xf32>
    %16 = arith.maximumf %14, %15 : vector<16x128xf32>
    %17 = arith.truncf %16 : vector<16x128xf32> to vector<16x128xbf16>
    %c0_12 = arith.constant 0 : index
    %c0_13 = arith.constant 0 : index
    %18 = vector.load %arg6[%c0_12, %c0_13] : memref<128x128xbf16, #tpu.memory_space<vmem>>, vector<128x128xbf16>
    %cst_14 = arith.constant dense<0.000000e+00> : vector<16x128xf32>
    %19 = tpu.matmul %17, %18, %cst_14 {dimension_numbers = #tpu.dot_dimension_numbers<[1], [0], [0], [1], [0, 0, 1, 1], [], []>} : vector<16x128xbf16>, vector<128x128xbf16>, vector<16x128xf32> -> vector<16x128xf32>
    %c0_15 = arith.constant 0 : index
    %c0_16 = arith.constant 0 : index
    %20 = vector.load %arg7[%c0_15, %c0_16] : memref<1x128xf32, #tpu.memory_space<vmem>>, vector<1x128xf32>
    %21 = vector.broadcast %20 : vector<1x128xf32> to vector<16x128xf32>
    %22 = arith.addf %19, %21 : vector<16x128xf32>
    %c0_17 = arith.constant 0 : index
    %c0_18 = arith.constant 0 : index
    %23 = vector.load %arg8[%c0_17, %c0_18] : memref<16x128xf32, #tpu.memory_space<vmem>>, vector<16x128xf32>
    tpu.vector_store %arg8[%c0_17, %c0_18], %22 {strides = array<i32>} : memref<16x128xf32, #tpu.memory_space<vmem>>, vector<16x128xf32>,
    return
  }
  func.func @transform_0(%arg0: i32) -> (i32, i32) {
    %c0_i32 = arith.constant 0 : i32
    %c0_i32_0 = arith.constant 0 : i32
    return %arg0, %c0_i32 : i32, i32
  }
  func.func @transform_1(%arg0: i32) -> (i32, i32) {
    %c0_i32 = arith.constant 0 : i32
    %c0_i32_0 = arith.constant 0 : i32
    %c0_i32_1 = arith.constant 0 : i32
    return %c0_i32, %c0_i32_0 : i32, i32
  }
  func.func @transform_2(%arg0: i32) -> (i32, i32) {
    %c0_i32 = arith.constant 0 : i32
    %c0_i32_0 = arith.constant 0 : i32
    %c0_i32_1 = arith.constant 0 : i32
    return %c0_i32, %c0_i32_0 : i32, i32
  }
  func.func @transform_3(%arg0: i32) -> (i32, i32) {
    %c0_i32 = arith.constant 0 : i32
    %c0_i32_0 = arith.constant 0 : i32
    %c0_i32_1 = arith.constant 0 : i32
    return %c0_i32, %c0_i32_0 : i32, i32
  }
  func.func @transform_4(%arg0: i32) -> (i32, i32) {
    %c0_i32 = arith.constant 0 : i32
    %c0_i32_0 = arith.constant 0 : i32
    %c0_i32_1 = arith.constant 0 : i32
    return %c0_i32, %c0_i32_0 : i32, i32
  }
  func.func @transform_5(%arg0: i32) -> (i32, i32) {
    %c0_i32 = arith.constant 0 : i32
    %c0_i32_0 = arith.constant 0 : i32
    %c0_i32_1 = arith.constant 0 : i32
    return %c0_i32, %c0_i32_0 : i32, i32
  }
  func.func @transform_6(%arg0: i32) -> (i32, i32) {
    %c0_i32 = arith.constant 0 : i32
    %c0_i32_0 = arith.constant 0 : i32
    %c0_i32_1 = arith.constant 0 : i32
    return %c0_i32, %c0_i32_0 : i32, i32
  }
  func.func @transform_7(%arg0: i32) -> (i32, i32) {
    %c0_i32 = arith.constant 0 : i32
    %c0_i32_0 = arith.constant 0 : i32
    return %arg0, %c0_i32 : i32, i32
  }
}

</mosaic_0001>

<bundles_post_ra>
// kernel: tpu_custom_call.1
= control target key start
LH: loop header
LB: loop body
LE: loop exit
PB: predicated region body
PF: predicated region fallthrough
CT: control target
= control target key end

     0   :  { %12 = vsyncpa [#allocation3], 0  ;;  %s635_s0 = inlined_call_operand.hbm [shape: f32[16,32], index: 0, kind: input, shape index: {}]   ;;  %s636_s1 = inlined_call_operand.hbm [shape: bf16[32,128], index: 1, kind: input, shape index: {}]   ;;  %s637_s2 = inlined_call_operand.vmem [shape: f32[1,128], index: 2, kind: input, shape index: {}]   ;;  %s638_s3 = inlined_call_operand.hbm [shape: bf16[128,128], index: 3, kind: input, shape index: {}]   ;;  %s639_s4 = inlined_call_operand.vmem [shape: f32[1,128], index: 4, kind: input, shape index: {}]   ;;  %s640_s5 = inlined_call_operand.hbm [shape: bf16[128,128], index: 5, kind: input, shape index: {}]   ;;  %s641_s6 = inlined_call_operand.vmem [shape: f32[1,128], index: 6, kind: input, shape index: {}]   ;;  %s642_s7 = inlined_call_operand.hbm [shape: f32[16,128], index: 7, kind: output, shape index: {}]  }
   0x1   :  { %13 = vsyncpa [#allocation6], 0 }
   0x2   :  { %14 = vsyncpa [#allocation9], 0  ;;  %s33_s26 = sshll.u32 %s636_s1, 4  ;;  %s34_s26 = int_to_ptr.hbm [resolvable:$true] %s33_s26 }
   0x3   :  { %15 = vsyncpa [#allocation4], 0  ;;  %s556_s27 = smov [#allocation5]   ;;  %s20_s8 = sshll.u32 %s635_s0, 4  ;;  %s21_s8 = int_to_ptr.hbm [resolvable:$true] %s20_s8 }
   0x4   :  { %s35_s28 = sshll.u32 %s556_s27, 4  ;;  %s557_s9 = smov 64   ;;  %s36_s28 = int_to_ptr.vmem [resolvable:$true] %s35_s28 }
   0x5   :  { %s558_s10 = smov 4   ;;  %s559_s11 = smov [#allocation2]  }
   0x6   :  { %41 = dma.hbm_to_vmem [thread:$0]  %s34_s26, 256, %s36_s28, [#allocation6], %s557_s9, %s557_s9, %s558_s10  }
   0x7   :  { %s22_s12 = sshll.u32 %s559_s11, 4  ;;  %s560_s13 = smov 128   ;;  %s23_s12 = int_to_ptr.vmem [resolvable:$true] %s22_s12 }
   0x8   :  { %s561_s14 = smov 8   ;;  %s48_s16 = sshll.u32 %s638_s3, 4  ;;  %s49_s16 = int_to_ptr.hbm [resolvable:$true] %s48_s16 }
   0x9   :  { %28 = dma.hbm_to_vmem [thread:$0]  %s21_s8, 256, %s23_s12, [#allocation3], %s560_s13, %s560_s13, %s561_s14  }
   0xa   :  { %s562_s17 = smov [#allocation7]   ;;  %s63_s20 = sshll.u32 %s640_s5, 4  ;;  %s64_s20 = int_to_ptr.hbm [resolvable:$true] %s63_s20 }
   0xb   :  { %s50_s0 = sshll.u32 %s562_s17, 4  ;;  %s563_s21 = smov [#allocation8]   ;;  %s51_s0 = int_to_ptr.vmem [resolvable:$true] %s50_s0 }
   0xc   :  { %56 = dma.hbm_to_vmem [thread:$0]  %s49_s16, 1024, %s51_s0, [#allocation6], %s557_s9, %s557_s9, %s558_s10  }
   0xd   :  { %s65_s22 = sshll.u32 %s563_s21, 4  ;;  %s66_s22 = int_to_ptr.vmem [resolvable:$true] %s65_s22 }
   0xe   :  { %71 = dma.hbm_to_vmem [thread:$0]  %s64_s20, 1024, %s66_s22, [#allocation9], %s557_s9, %s557_s9, %s558_s10  }
   0xf   :  { %548 = dma.done.wait [#allocation3], 256  }
  0x10   :  { %549 = vsyncadd [#allocation3], 4294967040 }
  0x11   :  { %550 = dma.done.wait [#allocation6], 1280  }
  0x12   :  { %551 = vsyncadd [#allocation6], 4294966016 }
  0x13   :  { %552 = dma.done.wait [#allocation9], 1024  }
  0x14   :  { %553 = vsyncadd [#allocation9], 4294966272  ;;  %v399_v0 = vld [vmem:[#allocation5 + $0x8] sm:$0xff]  ;;  %v398_v1 = vld [vmem:[#allocation5] sm:$0xff]  ;;  %vm114_vm0 = vcmask 261120   ;;  %s564_s26 = smov [#allocation10]  }
  0x15   :  { %v407_v2 = vld [vmem:[#allocation7 + $0x38] sm:$0xff]  ;;  %124 = vmatpush.bf16.msra.mxu0 %v399_v0  ;;  %v91_v3 = vld [vmem:[#allocation2] sm:$0xff]  ;;  %v92_v4 = vld [vmem:[#allocation2 + $0x8] sm:$0xff]  ;;  %s308_s27 = sshll.u32 %s564_s26, 4  ;;  %s309_s27 = int_to_ptr.vmem [resolvable:$true] %s308_s27 }
  0x16   :  { %203 = vmatpush.bf16.msra.mxu1 %v407_v2  ;;  %v406_v5 = vld [vmem:[#allocation7 + $0x30] sm:$0xff]  ;;  %v93_v6 = vpack.c.bf16 %v92_v4, %v91_v3  ;;  %v405_v7 = vld [vmem:[#allocation7 + $0x28] sm:$0xff]  ;;  %v404_v8 = vld [vmem:[#allocation7 + $0x20] sm:$0xff] }
  0x17   :  { %v403_v9 = vld [vmem:[#allocation7 + $0x18] sm:$0xff]  ;;  %v402_v10 = vld [vmem:[#allocation7 + $0x10] sm:$0xff]  ;;  %v401_v11 = vld [vmem:[#allocation7 + $0x8] sm:$0xff] }
  0x18   :  { %v400_v12 = vld [vmem:[#allocation7] sm:$0xff]  ;;  %v415_v13 = vld [vmem:[#allocation8 + $0x38] sm:$0xff]  ;;  %v414_v14 = vld [vmem:[#allocation8 + $0x30] sm:$0xff] }
  0x19   :  { %125 = vmatpush.bf16.msra.mxu0 %v398_v1  ;;  %288 = vmatpush.bf16.msra.mxu2 %v415_v13  ;;  %v413_v15 = vld [vmem:[#allocation8 + $0x28] sm:$0xff]  ;;  %v412_v16 = vld [vmem:[#allocation8 + $0x20] sm:$0xff]  ;;  %v411_v25 = vld [vmem:[#allocation8 + $0x18] sm:$0xff] }
  0x1a   :  { %204 = vmatpush.bf16.msra.mxu1 %v406_v5  ;;  %v425_v18 = vld [vmem:[%s637_s2] ss:$0 sm:$0xff]  ;;  %v410_v26 = vld [vmem:[#allocation8 + $0x10] sm:$0xff]  ;;  %v409_v27 = vld [vmem:[#allocation8 + $0x8] sm:$0xff] }
  0x1b   :  { %v408_v28 = vld [vmem:[#allocation8] sm:$0xff] }
  0x1c   :  { %333 = vmatmul.msk.bf16.vlgmr.msra.gmra.mxu0 %vm114_vm0, %v93_v6  ;;  %v426_v30 = vld [vmem:[%s639_s4] ss:$0 sm:$0xff]  ;;  %s310_s4 = sshll.u32 %s642_s7, 4  ;;  %s311_s4 = int_to_ptr.hbm [resolvable:$true] %s310_s4 }
  0x1d   :  { %289 = vmatpush.bf16.msra.mxu2 %v414_v14  ;;  %v427_v37 = vld [vmem:[%s641_s6] ss:$0 sm:$0xff] }
  0x1e   :  { %205 = vmatpush.bf16.msra.mxu1 %v405_v7 }
  0x21   :  { %290 = vmatpush.bf16.msra.mxu2 %v413_v15 }
  0x22   :  { %206 = vmatpush.bf16.msra.mxu1 %v404_v8 }
  0x25   :  { %291 = vmatpush.bf16.msra.mxu2 %v412_v16 }
  0x26   :  { %207 = vmatpush.bf16.msra.mxu1 %v403_v9 }
  0x29   :  { %292 = vmatpush.bf16.msra.mxu2 %v411_v25 }
  0x2a   :  { %208 = vmatpush.bf16.msra.mxu1 %v402_v10 }
  0x2d   :  { %293 = vmatpush.bf16.msra.mxu2 %v410_v26 }
  0x2e   :  { %209 = vmatpush.bf16.msra.mxu1 %v401_v11 }
  0x31   :  { %294 = vmatpush.bf16.msra.mxu2 %v409_v27 }
  0x32   :  { %210 = vmatpush.bf16.msra.mxu1 %v400_v12 }
  0x35   :  { %295 = vmatpush.bf16.msra.mxu2 %v408_v28 }
  0x99   :  { %v127_v17 = vpop.f32.mrf.mxu0 }
  0x9a   :  { %v128_v19 = vadd.f32 %v425_v18, %v127_v17 }
  0x9c   :  { %v132_v22 = vmax.f32 %v128_v19, 0.0 }
  0xa1   :  { %v129_v20 = vpop.f32.mrf.mxu0 }
  0xa2   :  { %v130_v21 = vadd.f32 %v425_v18, %v129_v20 }
  0xa4   :  { %v133_v23 = vmax.f32 %v130_v21, 0.0 }
  0xa6   :  { %v134_v24 = vpack.c.bf16 %v133_v23, %v132_v22 }
  0xa8   :  { %211 = vmatmul.bf16.vlgmr.msra.gmra.mxu1 %v134_v24 }
 0x125   :  { %v212_v29 = vpop.f32.mrf.mxu1 }
 0x126   :  { %v213_v31 = vadd.f32 %v426_v30, %v212_v29 }
 0x128   :  { %v217_v34 = vmax.f32 %v213_v31, 0.0 }
 0x12d   :  { %v214_v32 = vpop.f32.mrf.mxu1 }
 0x12e   :  { %v215_v33 = vadd.f32 %v426_v30, %v214_v32 }
 0x130   :  { %v218_v35 = vmax.f32 %v215_v33, 0.0 }
 0x132   :  { %v219_v36 = vpack.c.bf16 %v218_v35, %v217_v34 }
 0x134   :  { %296 = vmatmul.bf16.vlgmr.msra.gmra.mxu2 %v219_v36 }
 0x1b7   :  { %v297_v38 = vpop.f32.mrf.mxu2 }
 0x1b8   :  { %v298_v39 = vadd.f32 %v427_v37, %v297_v38 }
 0x1ba   :  { %302 = vst [vmem:[#allocation10] sm:$0xff] %v298_v39 }
 0x1bf   :  { %v299_v40 = vpop.f32.mrf.mxu2 }
 0x1c0   :  { %v300_v41 = vadd.f32 %v427_v37, %v299_v40 }
 0x1c2   :  { %303 = vst [vmem:[#allocation10 + $0x8] sm:$0xff] %v300_v41 }
 0x1c3   :  { %316 = dma.vmem_to_hbm [thread:$0]  %s309_s27, 256, %s311_s4, [#allocation4], %s560_s13, %s560_s13, %s561_s14  }
 0x1c4   :  { %554 = dma.done.wait [#allocation4], 256  }
 0x1c5   :  { %555 = vsyncadd [#allocation4], 4294967040 }
 0x1c6   :  { %321 = vsyncpa [#allocation3], 1 }
 0x1c7   :  { %322 = vsyncpa [#allocation6], 1 }
 0x1c8   :  { %323 = vsyncpa [#allocation9], 1 }
 0x1c9   :  { %324 = vsyncpa [#allocation4], 1 }

</bundles_post_ra>
